<compile_context>
chip_gen: v7x
topology: tpu7x:2x2x1
jax: 0.10.0
libtpu: 0.0.40
codegen_flags: <defaults>
</compile_context>

<pallas_src>
import functools

import jax
import jax.numpy as jnp
from jax import lax
from jax.experimental import pallas as pl
from jax.experimental.pallas import tpu as pltpu

_EPSILON = 1e-6
_LANES = 128


def _vmem_capacity_bytes():
    try:
        return int(pltpu.get_tpu_info().vmem_capacity_bytes)
    except Exception:
        return 64 * 1024 * 1024  # conservative (v7x-sized) fallback


def _make_kernel(rows, acc_w, chunks, steps, num_tiles, padded, with_bce,
                 precise_sigmoid, binary_target):
    """Kernel over one (rows, chunks*acc_w) block of logits / targets."""
    num_stats = 4 if with_bce else 3
    unroll = True if chunks <= 8 else 8

    def chunk_stats(x, t, carry):
        # sigmoid + (optional) numerically-stable BCE-with-logits, one exp and one
        # approximate (EUP) reciprocal per element:
        #   e = exp(-|x|);  sigmoid(x) = 1/(1+e) if x >= 0 else e/(1+e)
        #   bce = max(x, 0) - x*t + log1p(e)
        e = jnp.exp(-jnp.abs(x))
        d = 1.0 + e
        r = pl.reciprocal(d, approx=True)
        if precise_sigmoid:
            r = r * (2.0 - d * r)            # one cheap VPU Newton step
        p = jnp.where(x >= 0.0, r, e * r)    # sigmoid(x)
        tsq = t if binary_target else t * t
        new = (carry[0] + p * t, carry[1] + p * p, carry[2] + tsq)
        if with_bce:
            bce = jnp.maximum(x, 0.0) - x * t + jnp.log1p(e)
            new = new + (carry[3] + bce,)
        return new

    def kernel(x_ref, t_ref, acc_ref):
        # Zero this split's accumulator slab on its first tile.
        @pl.when(pl.program_id(1) == 0)
        def _init():
            acc_ref[...] = jnp.zeros_like(acc_ref)

        def compute():
            init = tuple(jnp.zeros((rows, acc_w), jnp.float32)
                         for _ in range(num_stats))
            if chunks == 1:
                out = chunk_stats(x_ref[...].astype(jnp.float32),
                                  t_ref[...].astype(jnp.float32), init)
            else:
                # Loop over 128-lane chunks: intermediates stay (rows, 128) wide.
                def body(c, carry):
                    off = pl.multiple_of(c * acc_w, acc_w)
                    x = x_ref[:, pl.ds(off, acc_w)].astype(jnp.float32)
                    t = t_ref[:, pl.ds(off, acc_w)].astype(jnp.float32)
                    return chunk_stats(x, t, carry)
                out = lax.fori_loop(0, chunks, body, init, unroll=unroll)
            for k in range(num_stats):
                acc_ref[0, k, :, :] += out[k]

        if padded:
            # Odd tile count split across 2 cores: the overflow step re-reads a
            # clamped (already processed) tile -- skip its accumulation.
            g = pl.program_id(0) * steps + pl.program_id(1)
            pl.when(g < num_tiles)(compute)
        else:
            compute()

    return kernel


def bce_dice_loss(logits, target, alpha=0.0, beta=1.0, *, tile_hw=None,
                  precise_sigmoid=True, binary_target=False):
    """alpha * BCEWithLogitsLoss + beta * (1 - mean(per-channel dice(sigmoid(x), t))).

    alpha / beta must be Python numbers; alpha == 0 compiles the BCE path away and
    gives exactly `_AbstractDiceLoss.forward` (sigmoid normalization + standard dice).
    """
    N, C, H, W = logits.shape
    assert logits.shape == target.shape
    rows, hw = N * C, H * W
    with_bce = (alpha != 0.0)
    num_stats = 4 if with_bce else 3

    # Free row-major views -- no transpose, no pad, no dtype copy in HBM.
    x2 = logits.reshape(rows, hw)
    t2 = target.reshape(rows, hw)

    # ---- generation-aware block sizing ------------------------------------
    vmem_cap = _vmem_capacity_bytes()
    if vmem_cap >= 100 * (1 << 20):        # v5e / v6e: 128 MiB VMEM, HBM-bound
        target_block_bytes = 4 << 20
        base_vmem_limit = 64 << 20
    else:                                   # v7x-class: 64 MiB VMEM, compute-leaning
        target_block_bytes = 3 << 19        # 1.5 MiB
        base_vmem_limit = 28 << 20

    if tile_hw is None:
        cols = max(_LANES, (target_block_bytes // (rows * 4)) // _LANES * _LANES)
        tile_hw = hw if cols >= hw else cols
    else:
        tile_hw = min(int(tile_hw), hw)
        if tile_hw < hw:
            assert tile_hw % _LANES == 0, "tile_hw must be a multiple of 128"

    if tile_hw == hw:
        num_tiles, rem = 1, 0
    else:
        num_tiles = hw // tile_hw
        rem = hw - num_tiles * tile_hw

    if tile_hw % _LANES == 0:
        acc_w, chunks = _LANES, tile_hw // _LANES
    else:  # single full-width tile narrower than / unaligned to 128 lanes
        acc_w, chunks = tile_hw, 1

    # Always split across two cores when there is more than one tile (v7x megacore).
    nsplit = 2 if num_tiles >= 2 else 1
    steps = pl.cdiv(num_tiles, nsplit)
    padded = nsplit * steps != num_tiles
    bulk = num_tiles * tile_hw

    # VMEM budget: 2 inputs x 2 pipeline buffers + accumulator slab + slack.
    in_bytes = rows * tile_hw * (logits.dtype.itemsize + target.dtype.itemsize) * 2
    acc_bytes = nsplit * num_stats * rows * acc_w * 4 * 2
    needed = in_bytes + acc_bytes + (4 << 20)
    if needed > (vmem_cap * 3) // 4:
        # TODO(synk): add a row-tiling grid axis for very large N*C instead of bailing.
        raise NotImplementedError(
            "N*C too large for a single 128-lane-wide block on this chip")
    vmem_limit = int(min(vmem_cap - (8 << 20), max(base_vmem_limit, needed)))

    if padded:
        in_idx = lambda s, j: (0, jnp.minimum(s * steps + j, num_tiles - 1))
    else:
        in_idx = lambda s, j: (0, s * steps + j)
    in_spec = pl.BlockSpec((rows, tile_hw), in_idx)
    acc_spec = pl.BlockSpec((1, num_stats, rows, acc_w), lambda s, j: (s, 0, 0, 0))

    acc = pl.pallas_call(
        _make_kernel(rows, acc_w, chunks, steps, num_tiles, padded, with_bce,
                     precise_sigmoid, binary_target),
        out_shape=jax.ShapeDtypeStruct((nsplit, num_stats, rows, acc_w), jnp.float32),
        grid_spec=pltpu.PrefetchScalarGridSpec(
            num_scalar_prefetch=0,
            grid=(nsplit, steps),
            in_specs=[in_spec, in_spec],
            out_specs=acc_spec,
        ),
        compiler_params=pltpu.CompilerParams(
            # TODO(synk): on v7x consider pltpu.CORE_PARALLEL on axis 0 if plain
            # "parallel" does not shard the split across the two TensorCores.
            dimension_semantics=("parallel", "arbitrary"),
            vmem_limit_bytes=vmem_limit,
        ),
    )(x2, t2)

    # ---- tiny (C-sized) finalization in plain JAX --------------------------
    def per_channel(k):  # fold splits, N and lanes -> (C,)
        return jnp.sum(acc[:, k].reshape(nsplit, N, C, acc_w), axis=(0, 1, 3))

    intersect = per_channel(0)
    denominator = per_channel(1) + per_channel(2)
    bce_sum = jnp.sum(acc[:, 3]) if with_bce else None

    if rem:
        # The (< one tile) ragged tail: cheaper here than padding the whole tensor
        # in HBM or relying on out-of-bounds block reads.
        xr = x2[:, bulk:].astype(jnp.float32)
        tr = t2[:, bulk:].astype(jnp.float32)
        pr = jax.nn.sigmoid(xr)
        intersect = intersect + jnp.sum((pr * tr).reshape(N, C, -1), axis=(0, 2))
        denominator = denominator + jnp.sum((pr * pr).reshape(N, C, -1), axis=(0, 2))
        denominator = denominator + jnp.sum((tr * tr).reshape(N, C, -1), axis=(0, 2))
        if with_bce:
            bce_sum = bce_sum + jnp.sum(
                jnp.maximum(xr, 0.0) - xr * tr + jnp.log1p(jnp.exp(-jnp.abs(xr))))

    per_channel_dice = 2.0 * intersect / (denominator + _EPSILON)
    loss = beta * (1.0 - jnp.mean(per_channel_dice))
    if with_bce:
        loss = loss + alpha * (bce_sum / float(N * C * H * W))
    return loss


def dice_loss(logits, target, **kwargs):
    """Exactly `_AbstractDiceLoss.forward` (sigmoid normalization, standard dice)."""
    return bce_dice_loss(logits, target, alpha=0.0, beta=1.0, **kwargs)


def _reference(logits, target, alpha, beta):
    """Pure-JAX reference mirroring the PyTorch module (+ optional BCE term)."""
    logits = logits.astype(jnp.float32)
    target = target.astype(jnp.float32)
    C = logits.shape[1]
    p = jax.nn.sigmoid(logits)
    pf = jnp.transpose(p, (1, 0, 2, 3)).reshape(C, -1)
    tf = jnp.transpose(target, (1, 0, 2, 3)).reshape(C, -1)
    intersect = jnp.sum(pf * tf, axis=-1)
    denom = jnp.sum(pf * pf, axis=-1) + jnp.sum(tf * tf, axis=-1)
    dice = 2.0 * intersect / (denom + _EPSILON)
    loss = beta * (1.0 - jnp.mean(dice))
    if alpha:
        bce = jnp.mean(jnp.maximum(logits, 0.0) - logits * target
                       + jnp.log1p(jnp.exp(-jnp.abs(logits))))
        loss = loss + alpha * bce
    return loss


if __name__ == "__main__":
    base_key = jax.random.PRNGKey(0)

    def check(shape, alpha, beta, tag, target_dtype=jnp.float32,
              rtol=1e-3, atol=1e-4, **kw):
        k1, k2 = jax.random.split(jax.random.fold_in(base_key, tag))
        logits = jax.random.normal(k1, shape, dtype=jnp.float32)
        target = jax.random.bernoulli(k2, 0.5, shape).astype(target_dtype)
        fn = jax.jit(functools.partial(bce_dice_loss, alpha=alpha, beta=beta, **kw))
        out = jax.block_until_ready(fn(logits, target))
        ref = _reference(logits, target, alpha, beta)
        assert jnp.allclose(out, ref, rtol=rtol, atol=atol), (shape, kw, out, ref)
        return out

    # 1) The module itself: pure sigmoid-Dice, single big tile, BCE path compiled away.
    check((2, 4, 16, 16), 0.0, 1.0, tag=0)
    # 2) BCE + Dice mix on the same shape (exercises the 4-stat kernel).
    check((2, 4, 16, 16), 0.5, 0.5, tag=1)
    # 3) Forced small tile: even 2-way split, 2 accumulation steps per split,
    #    binary-target fast path, plain-JAX ragged tail (576 = 4*128 + 64).
    check((2, 4, 24, 24), 0.0, 1.0, tag=2, tile_hw=128, binary_target=True)
    # 4) Odd tile count (400 = 3*128 + 16): clamped index_map + pl.when-skip split path.
    check((2, 4, 20, 20), 0.5, 0.5, tag=3, tile_hw=128)
    # 5) bf16 targets (less HBM traffic) + approximate-reciprocal sigmoid.
    check((2, 4, 16, 16), 0.0, 1.0, tag=4, target_dtype=jnp.bfloat16,
          precise_sigmoid=False, rtol=2e-3, atol=1e-3)

    print("KERNEL_OK")
</pallas_src>

<mosaic_0001>
module attributes {stable_mosaic.version = 11 : i64} {
  func.func @kernel(%arg0: i32, %arg1: i32, %arg2: memref<8x256xf32, #tpu.memory_space<vmem>>, %arg3: memref<8x256xf32, #tpu.memory_space<vmem>>, %arg4: memref<1x3x8x128xf32, #tpu.memory_space<vmem>>) attributes {dimension_semantics = [#tpu.dimension_semantics<parallel>, #tpu.dimension_semantics<arbitrary>], iteration_bounds = array<i64: 1, 1>, scalar_prefetch = 0 : i64, scratch_operands = 0 : i64, tpu.core_type = #tpu.core_type<tc>, window_params = [{transform_indices = @transform_0, window_bounds = array<i64: 8, 256>}, {transform_indices = @transform_1, window_bounds = array<i64: 8, 256>}, {transform_indices = @transform_2, window_bounds = array<i64: 1, 3, 8, 128>}]} {
    %c0_i32 = arith.constant 0 : i32
    %0 = arith.cmpi eq, %arg1, %c0_i32 : i32
    %1 = arith.extui %0 : i1 to i32
    %c0_i32_0 = arith.constant 0 : i32
    %2 = arith.cmpi ne, %1, %c0_i32_0 : i32
    scf.if %2 {
      %cst_38 = arith.constant 0.000000e+00 : f32
      %78 = vector.broadcast %cst_38 : f32 to vector<1x3x8x128xf32>
      %c0_39 = arith.constant 0 : index
      %c0_40 = arith.constant 0 : index
      %c0_41 = arith.constant 0 : index
      %c0_42 = arith.constant 0 : index
      %79 = vector.load %arg4[%c0_39, %c0_40, %c0_41, %c0_42] : memref<1x3x8x128xf32, #tpu.memory_space<vmem>>, vector<1x3x8x128xf32>
      tpu.vector_store %arg4[%c0_39, %c0_40, %c0_41, %c0_42], %78 {strides = array<i32>} : memref<1x3x8x128xf32, #tpu.memory_space<vmem>>, vector<1x3x8x128xf32>,
    } else {
    }
    %cst = arith.constant 0.000000e+00 : f32
    %3 = vector.broadcast %cst : f32 to vector<8x128xf32>
    %cst_1 = arith.constant 0.000000e+00 : f32
    %4 = vector.broadcast %cst_1 : f32 to vector<8x128xf32>
    %cst_2 = arith.constant 0.000000e+00 : f32
    %5 = vector.broadcast %cst_2 : f32 to vector<8x128xf32>
    %c0_i32_3 = arith.constant 0 : i32
    %c128_i32 = arith.constant 128 : i32
    %6 = arith.muli %c0_i32_3, %c128_i32 : i32
    %7 = tpu.assume_multiple %6, 128 : i32
    %c0 = arith.constant 0 : index
    %8 = arith.index_cast %7 : i32 to index
    %9 = vector.load %arg2[%c0, %8] : memref<8x256xf32, #tpu.memory_space<vmem>>, vector<8x128xf32>
    %c0_4 = arith.constant 0 : index
    %10 = arith.index_cast %7 : i32 to index
    %11 = vector.load %arg3[%c0_4, %10] : memref<8x256xf32, #tpu.memory_space<vmem>>, vector<8x128xf32>
    %12 = math.absf %9 : vector<8x128xf32>
    %cst_5 = arith.constant 0.000000e+00 : f32
    %13 = vector.broadcast %cst_5 : f32 to vector<8x128xf32>
    %14 = arith.subf %13, %12 : vector<8x128xf32>
    %15 = math.exp %14 : vector<8x128xf32>
    %cst_6 = arith.constant 1.000000e+00 : f32
    %16 = vector.broadcast %cst_6 : f32 to vector<8x128xf32>
    %17 = arith.addf %16, %15 : vector<8x128xf32>
    %18 = tpu.reciprocal %17 {approx = true} : vector<8x128xf32> -> vector<8x128xf32>
    %19 = arith.mulf %17, %18 : vector<8x128xf32>
    %cst_7 = arith.constant 2.000000e+00 : f32
    %20 = vector.broadcast %cst_7 : f32 to vector<8x128xf32>
    %21 = arith.subf %20, %19 : vector<8x128xf32>
    %22 = arith.mulf %18, %21 : vector<8x128xf32>
    %cst_8 = arith.constant 0.000000e+00 : f32
    %23 = vector.broadcast %cst_8 : f32 to vector<8x128xf32>
    %24 = arith.cmpf oge, %9, %23 : vector<8x128xf32>
    %25 = arith.mulf %15, %22 : vector<8x128xf32>
    %26 = arith.select %24, %22, %25 : vector<8x128xi1>, vector<8x128xf32>
    %27 = arith.mulf %11, %11 : vector<8x128xf32>
    %28 = arith.mulf %26, %11 : vector<8x128xf32>
    %29 = arith.addf %3, %28 : vector<8x128xf32>
    %30 = arith.mulf %26, %26 : vector<8x128xf32>
    %31 = arith.addf %4, %30 : vector<8x128xf32>
    %32 = arith.addf %5, %27 : vector<8x128xf32>
    %c1_i32 = arith.constant 1 : i32
    %c128_i32_9 = arith.constant 128 : i32
    %33 = arith.muli %c1_i32, %c128_i32_9 : i32
    %34 = tpu.assume_multiple %33, 128 : i32
    %c0_10 = arith.constant 0 : index
    %35 = arith.index_cast %34 : i32 to index
    %36 = vector.load %arg2[%c0_10, %35] : memref<8x256xf32, #tpu.memory_space<vmem>>, vector<8x128xf32>
    %c0_11 = arith.constant 0 : index
    %37 = arith.index_cast %34 : i32 to index
    %38 = vector.load %arg3[%c0_11, %37] : memref<8x256xf32, #tpu.memory_space<vmem>>, vector<8x128xf32>
    %39 = math.absf %36 : vector<8x128xf32>
    %cst_12 = arith.constant 0.000000e+00 : f32
    %40 = vector.broadcast %cst_12 : f32 to vector<8x128xf32>
    %41 = arith.subf %40, %39 : vector<8x128xf32>
    %42 = math.exp %41 : vector<8x128xf32>
    %cst_13 = arith.constant 1.000000e+00 : f32
    %43 = vector.broadcast %cst_13 : f32 to vector<8x128xf32>
    %44 = arith.addf %43, %42 : vector<8x128xf32>
    %45 = tpu.reciprocal %44 {approx = true} : vector<8x128xf32> -> vector<8x128xf32>
    %46 = arith.mulf %44, %45 : vector<8x128xf32>
    %cst_14 = arith.constant 2.000000e+00 : f32
    %47 = vector.broadcast %cst_14 : f32 to vector<8x128xf32>
    %48 = arith.subf %47, %46 : vector<8x128xf32>
    %49 = arith.mulf %45, %48 : vector<8x128xf32>
    %cst_15 = arith.constant 0.000000e+00 : f32
    %50 = vector.broadcast %cst_15 : f32 to vector<8x128xf32>
    %51 = arith.cmpf oge, %36, %50 : vector<8x128xf32>
    %52 = arith.mulf %42, %49 : vector<8x128xf32>
    %53 = arith.select %51, %49, %52 : vector<8x128xi1>, vector<8x128xf32>
    %54 = arith.mulf %38, %38 : vector<8x128xf32>
    %55 = arith.mulf %53, %38 : vector<8x128xf32>
    %56 = arith.addf %29, %55 : vector<8x128xf32>
    %57 = arith.mulf %53, %53 : vector<8x128xf32>
    %58 = arith.addf %31, %57 : vector<8x128xf32>
    %59 = arith.addf %32, %54 : vector<8x128xf32>
    %c2_i32 = arith.constant 2 : i32
    %c0_16 = arith.constant 0 : index
    %c0_17 = arith.constant 0 : index
    %c0_18 = arith.constant 0 : index
    %c0_19 = arith.constant 0 : index
    %60 = vector.load %arg4[%c0_16, %c0_17, %c0_18, %c0_19] : memref<1x3x8x128xf32, #tpu.memory_space<vmem>>, vector<1x1x8x128xf32>
    %61 = vector.shape_cast %60 : vector<1x1x8x128xf32> to vector<8x128xf32>
    %62 = arith.addf %61, %56 : vector<8x128xf32>
    %c0_20 = arith.constant 0 : index
    %c0_21 = arith.constant 0 : index
    %c0_22 = arith.constant 0 : index
    %c0_23 = arith.constant 0 : index
    %63 = vector.load %arg4[%c0_20, %c0_21, %c0_22, %c0_23] : memref<1x3x8x128xf32, #tpu.memory_space<vmem>>, vector<1x1x8x128xf32>
    %64 = vector.shape_cast %63 : vector<1x1x8x128xf32> to vector<8x128xf32>
    %65 = vector.shape_cast %62 : vector<8x128xf32> to vector<1x1x8x128xf32>
    tpu.vector_store %arg4[%c0_20, %c0_21, %c0_22, %c0_23], %65 {strides = array<i32>} : memref<1x3x8x128xf32, #tpu.memory_space<vmem>>, vector<1x1x8x128xf32>,
    %c0_24 = arith.constant 0 : index
    %c1 = arith.constant 1 : index
    %c0_25 = arith.constant 0 : index
    %c0_26 = arith.constant 0 : index
    %66 = vector.load %arg4[%c0_24, %c1, %c0_25, %c0_26] : memref<1x3x8x128xf32, #tpu.memory_space<vmem>>, vector<1x1x8x128xf32>
    %67 = vector.shape_cast %66 : vector<1x1x8x128xf32> to vector<8x128xf32>
    %68 = arith.addf %67, %58 : vector<8x128xf32>
    %c0_27 = arith.constant 0 : index
    %c1_28 = arith.constant 1 : index
    %c0_29 = arith.constant 0 : index
    %c0_30 = arith.constant 0 : index
    %69 = vector.load %arg4[%c0_27, %c1_28, %c0_29, %c0_30] : memref<1x3x8x128xf32, #tpu.memory_space<vmem>>, vector<1x1x8x128xf32>
    %70 = vector.shape_cast %69 : vector<1x1x8x128xf32> to vector<8x128xf32>
    %71 = vector.shape_cast %68 : vector<8x128xf32> to vector<1x1x8x128xf32>
    tpu.vector_store %arg4[%c0_27, %c1_28, %c0_29, %c0_30], %71 {strides = array<i32>} : memref<1x3x8x128xf32, #tpu.memory_space<vmem>>, vector<1x1x8x128xf32>,
    %c0_31 = arith.constant 0 : index
    %c2 = arith.constant 2 : index
    %c0_32 = arith.constant 0 : index
    %c0_33 = arith.constant 0 : index
    %72 = vector.load %arg4[%c0_31, %c2, %c0_32, %c0_33] : memref<1x3x8x128xf32, #tpu.memory_space<vmem>>, vector<1x1x8x128xf32>
    %73 = vector.shape_cast %72 : vector<1x1x8x128xf32> to vector<8x128xf32>
    %74 = arith.addf %73, %59 : vector<8x128xf32>
    %c0_34 = arith.constant 0 : index
    %c2_35 = arith.constant 2 : index
    %c0_36 = arith.constant 0 : index
    %c0_37 = arith.constant 0 : index
    %75 = vector.load %arg4[%c0_34, %c2_35, %c0_36, %c0_37] : memref<1x3x8x128xf32, #tpu.memory_space<vmem>>, vector<1x1x8x128xf32>
    %76 = vector.shape_cast %75 : vector<1x1x8x128xf32> to vector<8x128xf32>
    %77 = vector.shape_cast %74 : vector<8x128xf32> to vector<1x1x8x128xf32>
    tpu.vector_store %arg4[%c0_34, %c2_35, %c0_36, %c0_37], %77 {strides = array<i32>} : memref<1x3x8x128xf32, #tpu.memory_space<vmem>>, vector<1x1x8x128xf32>,
    return
  }
  func.func @transform_0(%arg0: i32, %arg1: i32) -> (i32, i32) {
    %c1_i32 = arith.constant 1 : i32
    %0 = arith.muli %arg0, %c1_i32 : i32
    %1 = arith.addi %0, %arg1 : i32
    %c0_i32 = arith.constant 0 : i32
    %c0_i32_0 = arith.constant 0 : i32
    return %c0_i32, %1 : i32, i32
  }
  func.func @transform_1(%arg0: i32, %arg1: i32) -> (i32, i32) {
    %c1_i32 = arith.constant 1 : i32
    %0 = arith.muli %arg0, %c1_i32 : i32
    %1 = arith.addi %0, %arg1 : i32
    %c0_i32 = arith.constant 0 : i32
    %c0_i32_0 = arith.constant 0 : i32
    return %c0_i32, %1 : i32, i32
  }
  func.func @transform_2(%arg0: i32, %arg1: i32) -> (i32, i32, i32, i32) {
    %c0_i32 = arith.constant 0 : i32
    %c0_i32_0 = arith.constant 0 : i32
    %c0_i32_1 = arith.constant 0 : i32
    %c0_i32_2 = arith.constant 0 : i32
    return %arg0, %c0_i32, %c0_i32_0, %c0_i32_1 : i32, i32, i32, i32
  }
}

</mosaic_0001>

<bundles_post_ra>
// kernel: bce_dice_loss.1
= control target key start
LH: loop header
LB: loop body
LE: loop exit
PB: predicated region body
PF: predicated region fallthrough
CT: control target
= control target key end

     0   :  { %s182_s0 = inlined_call_operand.vmem [shape: f32[8,256], index: 0, kind: input, shape index: {}]   ;;  %s183_s1 = inlined_call_operand.vmem [shape: f32[8,256], index: 1, kind: input, shape index: {}]   ;;  %s184_s2 = inlined_call_operand.vmem [shape: f32[1,3,8,128], index: 2, kind: output, shape index: {}]  }
   0x1   :  { %v62_v0 = vld [vmem:[%s182_s0] sm:$0xff]  ;;  %v131_v2 = vld [vmem:[%s182_s0 + $0x8] sm:$0xff] }
   0x2   :  { %v63_v1 = vld [vmem:[%s183_s1] sm:$0xff]  ;;  %v64_v3 = vand.u32 2147483647, %v62_v0  ;;  %v132_v4 = vld [vmem:[%s183_s1 + $0x8] sm:$0xff]  ;;  %v86_v5 = vand.u32 2147483647, %v131_v2 }
   0x3   :  { %v76_v6 = vmul.f32 %v63_v1, %v63_v1  ;;  %v98_v7 = vmul.f32 %v132_v4, %v132_v4  ;;  %vm73_vm0 = vcmp.ge.f32.partialorder %v62_v0, 0.0  ;;  %vm95_vm1 = vcmp.ge.f32.partialorder %v131_v2, 0.0 }
   0x4   :  { %v65_v8 = vsub.f32 0.0, %v64_v3  ;;  %v87_v9 = vsub.f32 0.0, %v86_v5 }
   0x5   :  { %v103_v10 = vadd.f32 %v98_v7, %v76_v6 }
   0x6   :  { %v66_v11 = vmul.f32 1.442695, %v65_v8  ;;  %v88_v12 = vmul.f32 1.442695, %v87_v9 }
   0x7   :  { %136 = vst [vmem:[%s184_s2 + $0x10] sm:$0xff] %v103_v10 }
   0x8   :  { %138 = vpow2.f32 %v66_v11 }
   0x9   :  { %140 = vpow2.f32 %v88_v12 }
  0x12   :  { %v139_v13 = vpop.eup %138 }
  0x13   :  { %v141_v14 = vpop.eup %140  ;;  %v68_v15 = vadd.f32 1.0, %v139_v13 }
  0x14   :  { %v90_v16 = vadd.f32 1.0, %v141_v14 }
  0x15   :  { %142 = vrcp.f32 %v68_v15 }
  0x16   :  { %144 = vrcp.f32 %v90_v16 }
  0x1f   :  { %v143_v17 = vpop.eup %142 }
  0x20   :  { %v145_v18 = vpop.eup %144  ;;  %v70_v19 = vmul.f32 %v143_v17, %v68_v15 }
  0x21   :  { %v92_v20 = vmul.f32 %v145_v18, %v90_v16 }
  0x22   :  { %v71_v21 = vsub.f32 2.0, %v70_v19 }
  0x23   :  { %v93_v22 = vsub.f32 2.0, %v92_v20 }
  0x24   :  { %v72_v23 = vmul.f32 %v143_v17, %v71_v21 }
  0x25   :  { %v94_v24 = vmul.f32 %v145_v18, %v93_v22 }
  0x26   :  { %v74_v25 = vmul.f32 %v139_v13, %v72_v23 }
  0x27   :  { %v96_v26 = vmul.f32 %v141_v14, %v94_v24 }
  0x28   :  { %v75_v27 = vsel %vm73_vm0, %v72_v23, %v74_v25 }
  0x29   :  { %v77_v28 = vmul.f32 %v75_v27, %v63_v1  ;;  %v97_v29 = vsel %vm95_vm1, %v94_v24, %v96_v26  ;;  %v79_v30 = vmul.f32 %v75_v27, %v75_v27 }
  0x2a   :  { %v99_v31 = vmul.f32 %v132_v4, %v97_v29  ;;  %v101_v32 = vmul.f32 %v97_v29, %v97_v29 }
  0x2c   :  { %v100_v33 = vadd.f32 %v99_v31, %v77_v28  ;;  %v102_v34 = vadd.f32 %v101_v32, %v79_v30 }
  0x2e   :  { %106 = vst [vmem:[%s184_s2] sm:$0xff] %v100_v33  ;;  %134 = vst [vmem:[%s184_s2 + $0x8] sm:$0xff] %v102_v34 }

</bundles_post_ra>
